<compile_context>
chip_gen: v5e
topology: v5e:2x2
jax: 0.10.0
libtpu: 0.0.40
codegen_flags: <defaults>
</compile_context>

<pallas_src>
import jax
import jax.numpy as jnp
from jax.experimental import pallas as pl
from jax.experimental.pallas import tpu as pltpu

# Un-folded module weights (kept separate to preserve torch's evaluation /
# rounding order: round(dot(w1,x)) + round(dot(w2,x))).
_W1 = (1.0, 2.0)
_W2 = (3.0, 4.0)


def _single_kernel(x_ref, o_ref):
    # x_ref: (2,) f32 in SMEM; o_ref: (1,) f32 in SMEM.
    # Pure scalar-unit math: two 2-element dots + one add.
    x0 = x_ref[0]
    x1 = x_ref[1]
    o1 = _W1[0] * x0 + _W1[1] * x1
    o2 = _W2[0] * x0 + _W2[1] * x1
    o_ref[0] = o1 + o2


_single_call = pl.pallas_call(
    _single_kernel,
    out_shape=jax.ShapeDtypeStruct((1,), jnp.float32),
    in_specs=[pl.BlockSpec(memory_space=pltpu.MemorySpace.SMEM)],
    out_specs=pl.BlockSpec(memory_space=pltpu.MemorySpace.SMEM),
    cost_estimate=pl.CostEstimate(flops=7, transcendentals=0, bytes_accessed=12),
)


@jax.jit
def module_a_forward(x):
    """JAX/Pallas equivalent of ModuleA.forward for a single length-2 input."""
    x = jnp.asarray(x, jnp.float32).reshape(2)
    return _single_call(x)[0]  # 0-d scalar, matching torch


def _batched_kernel(xt_ref, o_ref):
    # xt_ref: (2, B) f32 in VMEM (batch along lanes); o_ref: (1, B) f32.
    # Elementwise VPU mul/add; lane-dense unmasked store.
    x0 = xt_ref[0:1, :]
    x1 = xt_ref[1:2, :]
    o1 = _W1[0] * x0 + _W1[1] * x1
    o2 = _W2[0] * x0 + _W2[1] * x1
    o_ref[...] = o1 + o2


@jax.jit
def module_a_forward_batched(xb):
    """Batched ModuleA.forward: xb shape (B, 2), B a multiple of 128. Returns (B,)."""
    xb = jnp.asarray(xb, jnp.float32)
    b = xb.shape[0]
    xt = xb.T  # (2, B): batch along the lane (fast) axis
    out = pl.pallas_call(
        _batched_kernel,
        out_shape=jax.ShapeDtypeStruct((1, b), jnp.float32),
        in_specs=[pl.BlockSpec(memory_space=pltpu.MemorySpace.VMEM)],
        out_specs=pl.BlockSpec(memory_space=pltpu.MemorySpace.VMEM),
        cost_estimate=pl.CostEstimate(
            flops=7 * b, transcendentals=0, bytes_accessed=12 * b),
    )(xt)
    return out[0]


if __name__ == "__main__":
    key = jax.random.PRNGKey(0)
    k1, k2 = jax.random.split(key)

    w1 = jnp.array([1.0, 2.0], jnp.float32)
    w2 = jnp.array([3.0, 4.0], jnp.float32)

    # Single length-2 forward (matches the torch module's call signature).
    x = jax.random.normal(k1, (2,), dtype=jnp.float32)
    result = module_a_forward(x)
    jax.block_until_ready(result)
    ref = jnp.dot(w1, x) + jnp.dot(w2, x)
    assert jnp.allclose(result, ref, atol=1e-6, rtol=1e-6), (result, ref)

    # Batched throughput variant (amortizes launch overhead over 128 inputs).
    xb = jax.random.normal(k2, (128, 2), dtype=jnp.float32)
    result_b = module_a_forward_batched(xb)
    jax.block_until_ready(result_b)
    ref_b = xb @ w1 + xb @ w2
    assert result_b.shape == (128,)
    assert jnp.allclose(result_b, ref_b, atol=1e-6, rtol=1e-6), "batched mismatch"

    print("KERNEL_OK")
</pallas_src>

<mosaic_0001>
module attributes {stable_mosaic.version = 11 : i64} {
  func.func @_single_kernel(%arg0: memref<2xf32, #tpu.memory_space<smem>>, %arg1: memref<1xf32, #tpu.memory_space<smem>>) attributes {dimension_semantics = [], scalar_prefetch = 0 : i64, scratch_operands = 0 : i64, tpu.core_type = #tpu.core_type<tc>} {
    %c0 = arith.constant 0 : index
    %0 = memref.load %arg0[%c0] : memref<2xf32, #tpu.memory_space<smem>>
    %c1 = arith.constant 1 : index
    %1 = memref.load %arg0[%c1] : memref<2xf32, #tpu.memory_space<smem>>
    %cst = arith.constant 1.000000e+00 : f32
    %2 = arith.mulf %cst, %0 : f32
    %cst_0 = arith.constant 2.000000e+00 : f32
    %3 = arith.mulf %cst_0, %1 : f32
    %4 = arith.addf %2, %3 : f32
    %cst_1 = arith.constant 3.000000e+00 : f32
    %5 = arith.mulf %cst_1, %0 : f32
    %cst_2 = arith.constant 4.000000e+00 : f32
    %6 = arith.mulf %cst_2, %1 : f32
    %7 = arith.addf %5, %6 : f32
    %8 = arith.addf %4, %7 : f32
    %c0_3 = arith.constant 0 : index
    %9 = memref.load %arg1[%c0_3] : memref<1xf32, #tpu.memory_space<smem>>
    memref.store %8, %arg1[%c0_3] : memref<1xf32, #tpu.memory_space<smem>>
    return
  }
}

</mosaic_0001>

<bundles_post_ra>
// kernel: module_a_forward.1
= control target key start
LH: loop header
LB: loop body
LE: loop exit
PB: predicated region body
PF: predicated region fallthrough
CT: control target
= control target key end

     0   :  { %6 = vsyncpa [#allocation3], 0  ;;  %s97_s0 = inlined_call_operand.hbm [shape: f32[2], index: 0, kind: input, shape index: {}]   ;;  %s98_s1 = inlined_call_operand.hbm [shape: f32[1], index: 1, kind: output, shape index: {}]  }
   0x1   :  { %7 = vsyncpa [#allocation4], 0  ;;  %s13_s8 = sshll.u32 %s97_s0, 4  ;;  %s79_s9 = smov [#allocation2]   ;;  %s14_s8 = int_to_ptr.hbm [resolvable:$true] %s13_s8 }
   0x2   :  { %16 = dma.hbm_to_smem %s14_s8, 16, %s79_s9, [#allocation3]  }
   0x3   :  { %75 = dma.done.wait [#allocation3], 16  }
   0x4   :  { %76 = vsyncadd [#allocation3], 4294967280 }
   0x5   :  { %21 = sfence }
   0x6   :  { %s22_s10 = sld [smem:[#allocation2]]  ;;  %s37_s17 = sshll.u32 %s98_s1, 4  ;;  %s38_s17 = int_to_ptr.hbm [resolvable:$true] %s37_s17 }
   0x7   :  { %s48_s11 = sld [smem:[#allocation2 + $0x1]]  ;;  %s80_s0 = smov [#allocation5]  }
   0xc   :  { %s26_s12 = smul.f32 3.0, %s22_s10 }
   0xd   :  { %s24_s13 = smul.f32 2.0, %s48_s11 }
   0xe   :  { %s27_s14 = smul.f32 4.0, %s48_s11 }
   0xf   :  { %s25_s18 = sadd.f32 %s24_s13, %s22_s10 }
  0x10   :  { %s28_s19 = sadd.f32 %s27_s14, %s26_s12 }
  0x12   :  { %s29_s20 = sadd.f32 %s28_s19, %s25_s18 }
  0x14   :  { %31 = sst [smem:[#allocation5]] %s29_s20 }
  0x15   :  { %40 = dma.smem_to_hbm %s80_s0, 16, %s38_s17, [#allocation4]  }
  0x16   :  { %77 = dma.done.wait [#allocation4], 16  }
  0x17   :  { %78 = vsyncadd [#allocation4], 4294967280 }
  0x18   :  { %45 = sfence }
  0x19   :  { %46 = vsyncpa [#allocation3], 1 }
  0x1a   :  { %47 = vsyncpa [#allocation4], 1 }

</bundles_post_ra>
